<compile_context>
chip_gen: v6e
topology: v6e:2x2x1
jax: 0.10.0
libtpu: 0.0.40
codegen_flags: <defaults>
</compile_context>

<pallas_src>
import functools

import jax
import jax.numpy as jnp
from jax.experimental import pallas as pl
from jax.experimental.pallas import tpu as pltpu


def _round_up(x: int, m: int) -> int:
    return (x + m - 1) // m * m


def _vmem_budget_bytes() -> int:
    """Generation-aware VMEM budget (leave headroom for Mosaic scratch)."""
    try:
        cap = int(pltpu.get_tpu_info().vmem_capacity_bytes)
    except Exception:
        cap = 64 * 1024 * 1024  # conservative: v7x physical per-TC VMEM
    # Use at most 3/4 of physical, and never more than 96 MiB.
    return min(cap * 3 // 4, 96 * 1024 * 1024)


# ---------------------------------------------------------------------------
# Kernels
# ---------------------------------------------------------------------------

def _bimt_kernel_acc_in_out(x_ref, w_ref, b_ref, o_ref):
    """f32 output: accumulate directly into the resident output tile."""
    k = pl.program_id(2)

    @pl.when(k == 0)
    def _init():
        # Bias folded into the accumulator init (added exactly once per tile).
        o_ref[...] = jnp.broadcast_to(b_ref[...], o_ref.shape)

    o_ref[...] += jnp.dot(x_ref[...], w_ref[...],
                          preferred_element_type=jnp.float32)


def _bimt_kernel_scratch_acc(x_ref, w_ref, b_ref, o_ref, acc_ref):
    """Generic output dtype: f32 VMEM accumulator, cast on the last K step."""
    k = pl.program_id(2)

    @pl.when(k == 0)
    def _init():
        acc_ref[...] = jnp.broadcast_to(b_ref[...], acc_ref.shape)

    acc_ref[...] += jnp.dot(x_ref[...], w_ref[...],
                            preferred_element_type=jnp.float32)

    @pl.when(k == pl.num_programs(2) - 1)
    def _finalize():
        o_ref[...] = acc_ref[...].astype(o_ref.dtype)


# ---------------------------------------------------------------------------
# Jitted tiled matmul (weights/bias already padded; only x padded per call)
# ---------------------------------------------------------------------------

@functools.partial(
    jax.jit,
    static_argnames=("tm", "tn", "tk", "out_cols", "compute_dtype", "vmem_limit"),
)
def _bimt_matmul(x, w_padded, b_padded, *, tm, tn, tk, out_cols,
                 compute_dtype, vmem_limit):
    B, IN = x.shape
    Kp, Np = w_padded.shape
    Mp = _round_up(B, tm)
    cdt = jnp.dtype(compute_dtype)
    out_dtype = x.dtype

    # Cast x to the compute dtype (bf16 default) and zero-pad M/K; the K
    # padding contributes 0 to the dot, padded M rows are sliced off below.
    xp = x.astype(cdt)
    if Mp != B or Kp != IN:
        xp = jnp.pad(xp, ((0, Mp - B), (0, Kp - IN)))

    grid = (Mp // tm, Np // tn, Kp // tk)

    if out_dtype == jnp.float32:
        kernel = _bimt_kernel_acc_in_out
        scratch = []
    else:
        kernel = _bimt_kernel_scratch_acc
        scratch = [pltpu.VMEM((tm, tn), jnp.float32)]

    out = pl.pallas_call(
        kernel,
        out_shape=jax.ShapeDtypeStruct((Mp, Np), out_dtype),
        grid=grid,
        in_specs=[
            pl.BlockSpec((tm, tk), lambda i, j, k: (i, k)),   # x tile
            pl.BlockSpec((tk, tn), lambda i, j, k: (k, j)),   # W tile
            pl.BlockSpec((1, tn), lambda i, j, k: (0, j)),    # bias tile (f32)
        ],
        out_specs=pl.BlockSpec((tm, tn), lambda i, j, k: (i, j)),
        scratch_shapes=scratch,
        compiler_params=pltpu.CompilerParams(
            dimension_semantics=("parallel", "parallel", "arbitrary"),
            vmem_limit_bytes=int(vmem_limit),
        ),
    )(xp, w_padded, b_padded)

    if Mp != B or Np != out_cols:
        out = out[:B, :out_cols]
    return out


# ---------------------------------------------------------------------------
# Layer wrapper (pads params once, holds tile choices, dispatches tiny sizes)
# ---------------------------------------------------------------------------

class BIMTLayerPallas:
    """Pallas-TPU port of BIMTLayer: forward(x) = x @ weights + biases."""

    def __init__(self, weights, biases, coordinates=None, *,
                 compute_dtype=jnp.bfloat16,
                 tm_pref=1024, tn_pref=1024, tk_pref=1024,
                 min_flops_for_pallas=1 << 22):
        weights = jnp.asarray(weights)
        biases = jnp.asarray(biases)
        IN, OUT = weights.shape
        self.in_features, self.out_features = IN, OUT
        self.compute_dtype = jnp.dtype(compute_dtype)
        self.tm_pref = tm_pref
        self.min_flops_for_pallas = min_flops_for_pallas

        # Unpadded params kept for the tiny-problem XLA fallback.
        self.weights = weights
        self.biases = biases
        # 'coordinates' buffer does not participate in forward.
        self.coordinates = None if coordinates is None else jnp.asarray(coordinates)

        # N/K tiles: multiples of 256 (fills v6e/v7x 256x256 MXU passes; fine
        # on v5e's 128x128 MXU too), clamped to the padded layer dims.
        self.tn = min(tn_pref, _round_up(OUT, 256))
        self.tk = min(tk_pref, _round_up(IN, 256))
        self.Np = _round_up(OUT, self.tn)
        self.Kp = _round_up(IN, self.tk)

        # Pad + cast W ONCE (outside the per-call hot path). Bias stays f32.
        wp = jnp.pad(weights, ((0, self.Kp - IN), (0, self.Np - OUT)))
        self.w_padded = wp.astype(self.compute_dtype)
        bp = jnp.pad(biases.astype(jnp.float32), (0, self.Np - OUT))
        self.b_padded = bp.reshape(1, self.Np)

        self._vmem_budget = _vmem_budget_bytes()

    def connection_lengths(self):
        assert self.coordinates is not None
        return jnp.linalg.norm(self.coordinates, axis=0)

    def _m_tile(self, B, out_itemsize):
        """Pick tm (and vmem_limit) so the whole batch fits VMEM if possible."""
        cs = self.compute_dtype.itemsize
        tn, tk = self.tn, self.tk
        budget = self._vmem_budget
        # tm-independent bytes: double-buffered W tile + bias tile.
        fixed = 2 * tk * tn * cs + 2 * tn * 4
        # per-output-row bytes: double-buffered x/out tiles + f32 accumulator.
        per_row = 2 * tk * cs + 2 * tn * out_itemsize + tn * 4
        tm_cap = max(8, ((budget - fixed) // per_row) // 8 * 8)

        Mp8 = _round_up(B, 8)
        # Prefer tm == padded batch -> M grid axis of 1 -> W streamed once.
        tm = min(Mp8, tm_cap, self.tm_pref)
        Mp = _round_up(B, tm)

        # v7x megacore: ensure at least one "parallel" axis has >= 2 blocks.
        if Mp // tm == 1 and self.Np // tn == 1 and Mp8 >= 16:
            tm = _round_up(-(-Mp8 // 2), 8)
            Mp = _round_up(B, tm)

        footprint = fixed + tm * per_row
        vmem_limit = min(budget, max(footprint + 4 * 1024 * 1024,
                                     16 * 1024 * 1024))
        return tm, vmem_limit

    def __call__(self, x):
        B, IN = x.shape
        assert IN == self.in_features, (IN, self.in_features)
        # Tiny layers: plain XLA beats any pallas_call launch + lane padding.
        if 2 * B * IN * self.out_features < self.min_flops_for_pallas:
            return (x @ self.weights + self.biases).astype(x.dtype)
        tm, vmem_limit = self._m_tile(B, jnp.dtype(x.dtype).itemsize)
        return _bimt_matmul(
            x, self.w_padded, self.b_padded,
            tm=tm, tn=self.tn, tk=self.tk,
            out_cols=self.out_features,
            compute_dtype=self.compute_dtype.name,
            vmem_limit=int(vmem_limit),
        )


if __name__ == "__main__":
    key = jax.random.PRNGKey(0)
    kx, kw, kb, kc, kx2, kw2, kb2 = jax.random.split(key, 7)

    # --- Test 1: tiny module-like shapes, exact f32 path, forced Pallas ------
    batch, in_features, out_features = 8, 32, 16
    x = jax.random.normal(kx, (batch, in_features), dtype=jnp.float32)
    weights = jax.random.normal(kw, (in_features, out_features), dtype=jnp.float32)
    biases = jax.random.normal(kb, (out_features,), dtype=jnp.float32)
    coordinates = jax.random.normal(kc, (in_features, out_features), dtype=jnp.float32)

    layer_f32 = BIMTLayerPallas(weights, biases, coordinates,
                                compute_dtype=jnp.float32,
                                min_flops_for_pallas=0)   # force Pallas path
    out = jax.block_until_ready(layer_f32(x))
    ref = x @ weights + biases
    assert out.shape == (batch, out_features)
    assert jnp.allclose(out, ref, atol=1e-5, rtol=1e-5)
    _ = jax.block_until_ready(layer_f32.connection_lengths())  # buffer parity

    # Tiny-size dispatch (default threshold) falls back to XLA and matches.
    layer_dispatch = BIMTLayerPallas(weights, biases, coordinates)
    out_d = jax.block_until_ready(layer_dispatch(x))
    assert jnp.allclose(out_d, ref, atol=1e-5, rtol=1e-5)

    # --- Test 2: multi-block grid, default bf16 compute path -----------------
    b2, i2, o2 = 64, 512, 512
    x2 = jax.random.normal(kx2, (b2, i2), dtype=jnp.float32)
    w2 = jax.random.normal(kw2, (i2, o2), dtype=jnp.float32)
    bias2 = jax.random.normal(kb2, (o2,), dtype=jnp.float32)

    layer_bf16 = BIMTLayerPallas(w2, bias2, tn_pref=256, tk_pref=256,
                                 min_flops_for_pallas=0)  # grid (1, 2, 2)
    out2 = jax.block_until_ready(layer_bf16(x2))
    assert out2.shape == (b2, o2)

    # Primary check: against an XLA bf16-input / f32-accumulate matmul.
    ref2_bf16 = jnp.dot(x2.astype(jnp.bfloat16), w2.astype(jnp.bfloat16),
                        preferred_element_type=jnp.float32) + bias2
    assert jnp.allclose(out2, ref2_bf16, atol=1e-2, rtol=1e-2)
    # Sanity check: still close to the full-f32 reference (bf16 rounding only).
    ref2_f32 = x2 @ w2 + bias2
    assert jnp.allclose(out2, ref2_f32, atol=1.0, rtol=1e-1)

    print("KERNEL_OK")
</pallas_src>

<mosaic_0001>
module attributes {stable_mosaic.version = 11 : i64} {
  func.func @_bimt_kernel_acc_in_out(%arg0: i32, %arg1: i32, %arg2: i32, %arg3: memref<8x256xf32, #tpu.memory_space<vmem>>, %arg4: memref<256x256xf32, #tpu.memory_space<vmem>>, %arg5: memref<1x256xf32, #tpu.memory_space<vmem>>, %arg6: memref<8x256xf32, #tpu.memory_space<vmem>>) attributes {dimension_semantics = [#tpu.dimension_semantics<parallel>, #tpu.dimension_semantics<parallel>, #tpu.dimension_semantics<arbitrary>], iteration_bounds = array<i64: 1, 1, 1>, scalar_prefetch = 0 : i64, scratch_operands = 0 : i64, tpu.core_type = #tpu.core_type<tc>, window_params = [{transform_indices = @transform_0, window_bounds = array<i64: 8, 256>}, {transform_indices = @transform_1, window_bounds = array<i64: 256, 256>}, {transform_indices = @transform_2, window_bounds = array<i64: 1, 256>}, {transform_indices = @transform_3, window_bounds = array<i64: 8, 256>}]} {
    %c0_i32 = arith.constant 0 : i32
    %0 = arith.cmpi eq, %arg2, %c0_i32 : i32
    %1 = arith.extui %0 : i1 to i32
    %c0_i32_0 = arith.constant 0 : i32
    %2 = arith.cmpi ne, %1, %c0_i32_0 : i32
    scf.if %2 {
      %c0_8 = arith.constant 0 : index
      %c0_9 = arith.constant 0 : index
      %9 = vector.load %arg5[%c0_8, %c0_9] : memref<1x256xf32, #tpu.memory_space<vmem>>, vector<1x256xf32>
      %10 = vector.shape_cast %9 : vector<1x256xf32> to vector<1x256xf32>
      %11 = vector.broadcast %10 : vector<1x256xf32> to vector<8x256xf32>
      %c0_10 = arith.constant 0 : index
      %c0_11 = arith.constant 0 : index
      %12 = vector.load %arg6[%c0_10, %c0_11] : memref<8x256xf32, #tpu.memory_space<vmem>>, vector<8x256xf32>
      tpu.vector_store %arg6[%c0_10, %c0_11], %11 {strides = array<i32>} : memref<8x256xf32, #tpu.memory_space<vmem>>, vector<8x256xf32>,
    } else {
    }
    %c0 = arith.constant 0 : index
    %c0_1 = arith.constant 0 : index
    %3 = vector.load %arg6[%c0, %c0_1] : memref<8x256xf32, #tpu.memory_space<vmem>>, vector<8x256xf32>
    %c0_2 = arith.constant 0 : index
    %c0_3 = arith.constant 0 : index
    %4 = vector.load %arg3[%c0_2, %c0_3] : memref<8x256xf32, #tpu.memory_space<vmem>>, vector<8x256xf32>
    %c0_4 = arith.constant 0 : index
    %c0_5 = arith.constant 0 : index
    %5 = vector.load %arg4[%c0_4, %c0_5] : memref<256x256xf32, #tpu.memory_space<vmem>>, vector<256x256xf32>
    %cst = arith.constant dense<0.000000e+00> : vector<8x256xf32>
    %6 = tpu.matmul %4, %5, %cst {dimension_numbers = #tpu.dot_dimension_numbers<[1], [0], [0], [1], [0, 0, 1, 1], [], []>} : vector<8x256xf32>, vector<256x256xf32>, vector<8x256xf32> -> vector<8x256xf32>
    %7 = arith.addf %3, %6 : vector<8x256xf32>
    %c0_6 = arith.constant 0 : index
    %c0_7 = arith.constant 0 : index
    %8 = vector.load %arg6[%c0_6, %c0_7] : memref<8x256xf32, #tpu.memory_space<vmem>>, vector<8x256xf32>
    tpu.vector_store %arg6[%c0_6, %c0_7], %7 {strides = array<i32>} : memref<8x256xf32, #tpu.memory_space<vmem>>, vector<8x256xf32>,
    return
  }
  func.func @transform_0(%arg0: i32, %arg1: i32, %arg2: i32) -> (i32, i32) {
    %c0_i32 = arith.constant 0 : i32
    return %arg0, %arg2 : i32, i32
  }
  func.func @transform_1(%arg0: i32, %arg1: i32, %arg2: i32) -> (i32, i32) {
    %c0_i32 = arith.constant 0 : i32
    return %arg2, %arg1 : i32, i32
  }
  func.func @transform_2(%arg0: i32, %arg1: i32, %arg2: i32) -> (i32, i32) {
    %c0_i32 = arith.constant 0 : i32
    %c0_i32_0 = arith.constant 0 : i32
    return %c0_i32, %arg1 : i32, i32
  }
  func.func @transform_3(%arg0: i32, %arg1: i32, %arg2: i32) -> (i32, i32) {
    %c0_i32 = arith.constant 0 : i32
    return %arg0, %arg1 : i32, i32
  }
}

</mosaic_0001>

<bundles_post_ra>
// kernel: _bimt_matmul.1
= control target key start
LH: loop header
LB: loop body
LE: loop exit
PB: predicated region body
PF: predicated region fallthrough
CT: control target
= control target key end

     0   :  { %8 = vsyncpa [#allocation3], 0  ;;  %s219_s12 = smov [#allocation2]   ;;  %s260_s0 = inlined_call_operand.vmem [shape: f32[8,256], index: 0, kind: input, shape index: {}]   ;;  %s261_s1 = inlined_call_operand.hbm [shape: f32[256,256], index: 1, kind: input, shape index: {}]   ;;  %s262_s2 = inlined_call_operand.vmem [shape: f32[1,256], index: 2, kind: input, shape index: {}]   ;;  %s263_s3 = inlined_call_operand.vmem [shape: f32[8,256], index: 3, kind: output, shape index: {}]  }
   0x1   :  { %s16_s13 = sshll.u32 %s219_s12, 4  ;;  %s17_s13 = int_to_ptr.vmem [resolvable:$true] %s16_s13 }
   0x2   :  { %s205_s14 = scalar_lea.vmem %s17_s13, 8192  ;;  %p210_p1 = scmp.lt.s32.totalorder %s17_s13, %s17_s13 }
   0x3   :  { %p206_p0 = scmp.ne.s32.totalorder %s17_s13, %s205_s14  ;;  %p211_p2 = scmp.lt.s32.totalorder %s205_s14, %s205_s14 }
   0x5   :  { %p212_p3 = por %p211_p2, %p210_p1 }
   0x7   :  { %p213_p4 = pnand %p212_p3, %p206_p0 }
   0x9   :  { %216 = shalt.err (!%p213_p4)
}
   0xa   :  { %s220_s15 = smov 256   ;;  %s221_s16 = smov 16  }
   0xb   :  { %22 = dma.hbm_to_vmem [thread:$0]  %s261_s1, 8192, %s17_s13, [#allocation3], %s220_s15, %s220_s15, %s221_s16  }
   0xc   :  { %217 = dma.done.wait [#allocation3], 8192  }
   0xd   :  { %218 = vsyncadd [#allocation3], 4294959104  ;;  %v81_v0 = vld [vmem:[#allocation2 + $0xf8] sm:$0xff]  ;;  %v80_v1 = vld [vmem:[#allocation2 + $0xf0] sm:$0xff] }
   0xe   :  { %v79_v2 = vld [vmem:[#allocation2 + $0xe8] sm:$0xff]  ;;  %114 = vmatprep.subr.mxu0 %v81_v0  ;;  %v78_v3 = vld [vmem:[#allocation2 + $0xe0] sm:$0xff]  ;;  %v77_v4 = vld [vmem:[#allocation2 + $0xd8] sm:$0xff] }
   0xf   :  { %115 = vmatpush1.msra.mxu0 %v80_v1  ;;  %v76_v5 = vld [vmem:[#allocation2 + $0xd0] sm:$0xff]  ;;  %v75_v6 = vld [vmem:[#allocation2 + $0xc8] sm:$0xff]  ;;  %v74_v7 = vld [vmem:[#allocation2 + $0xc0] sm:$0xff] }
  0x10   :  { %116 = vmatprep.subr.mxu0 %v79_v2  ;;  %v73_v8 = vld [vmem:[#allocation2 + $0xb8] sm:$0xff]  ;;  %v72_v9 = vld [vmem:[#allocation2 + $0xb0] sm:$0xff]  ;;  %v71_v10 = vld [vmem:[#allocation2 + $0xa8] sm:$0xff]  ;;  %v34_v2 = vlaneseq }
  0x11   :  { %117 = vmatpush1.msra.mxu0 %v78_v3  ;;  %v70_v11 = vld [vmem:[#allocation2 + $0xa0] sm:$0xff]  ;;  %v69_v12 = vld [vmem:[#allocation2 + $0x98] sm:$0xff]  ;;  %v68_v13 = vld [vmem:[#allocation2 + $0x90] sm:$0xff] }
  0x12   :  { %118 = vmatprep.subr.mxu0 %v77_v4  ;;  %v67_v14 = vld [vmem:[#allocation2 + $0x88] sm:$0xff]  ;;  %v66_v15 = vld [vmem:[#allocation2 + $0x80] sm:$0xff]  ;;  %v65_v16 = vld [vmem:[#allocation2 + $0x78] sm:$0xff]  ;;  %v35_v3 = vshrl.u32 %v34_v2, 7 }
  0x13   :  { %119 = vmatpush1.msra.mxu0 %v76_v5  ;;  %v64_v17 = vld [vmem:[#allocation2 + $0x70] sm:$0xff]  ;;  %v63_v18 = vld [vmem:[#allocation2 + $0x68] sm:$0xff]  ;;  %v62_v19 = vld [vmem:[#allocation2 + $0x60] sm:$0xff] }
  0x14   :  { %120 = vmatprep.subr.mxu0 %v75_v6  ;;  %v61_v20 = vld [vmem:[#allocation2 + $0x58] sm:$0xff]  ;;  %v60_v21 = vld [vmem:[#allocation2 + $0x50] sm:$0xff]  ;;  %v59_v22 = vld [vmem:[#allocation2 + $0x48] sm:$0xff]  ;;  %v36_v4 = vsub.s32 0, %v35_v3  ;;  %v40_v6 = vsub.s32 1, %v35_v3 }
  0x15   :  { %121 = vmatpush1.msra.mxu0 %v74_v7  ;;  %v58_v23 = vld [vmem:[#allocation2 + $0x40] sm:$0xff]  ;;  %v49_v24 = vld [vmem:[%s260_s0 + $0x8] sm:$0xff]  ;;  %v57_v25 = vld [vmem:[#allocation2 + $0x38] sm:$0xff] }
  0x16   :  { %122 = vmatprep.subr.mxu0 %v73_v8  ;;  %178 = vmatprep.mubr.f32.mxu0 %v49_v24  ;;  %v56_v26 = vld [vmem:[#allocation2 + $0x30] sm:$0xff]  ;;  %v55_v27 = vld [vmem:[#allocation2 + $0x28] sm:$0xff]  ;;  %v54_v28 = vld [vmem:[#allocation2 + $0x20] sm:$0xff] }
  0x17   :  { %123 = vmatpush1.msra.mxu0 %v72_v9  ;;  %v53_v29 = vld [vmem:[#allocation2 + $0x18] sm:$0xff]  ;;  %v52_v30 = vld [vmem:[#allocation2 + $0x10] sm:$0xff]  ;;  %v51_v31 = vld [vmem:[#allocation2 + $0x8] sm:$0xff] }
  0x18   :  { %124 = vmatprep.subr.mxu0 %v71_v10  ;;  %v50_v32 = vld [vmem:[#allocation2] sm:$0xff]  ;;  %v113_v33 = vld [vmem:[#allocation2 + $0x1f8] sm:$0xff]  ;;  %v112_v34 = vld [vmem:[#allocation2 + $0x1f0] sm:$0xff] }
  0x19   :  { %125 = vmatpush1.msra.mxu0 %v70_v11  ;;  %v111_v35 = vld [vmem:[#allocation2 + $0x1e8] sm:$0xff]  ;;  %v110_v36 = vld [vmem:[#allocation2 + $0x1e0] sm:$0xff]  ;;  %v109_v37 = vld [vmem:[#allocation2 + $0x1d8] sm:$0xff] }
  0x1a   :  { %126 = vmatprep.subr.mxu0 %v69_v12  ;;  %v108_v38 = vld [vmem:[#allocation2 + $0x1d0] sm:$0xff]  ;;  %v107_v39 = vld [vmem:[#allocation2 + $0x1c8] sm:$0xff]  ;;  %v106_v40 = vld [vmem:[#allocation2 + $0x1c0] sm:$0xff] }
  0x1b   :  { %127 = vmatpush1.msra.mxu0 %v68_v13  ;;  %v105_v41 = vld [vmem:[#allocation2 + $0x1b8] sm:$0xff]  ;;  %v104_v42 = vld [vmem:[#allocation2 + $0x1b0] sm:$0xff]  ;;  %v103_v43 = vld [vmem:[#allocation2 + $0x1a8] sm:$0xff] }
  0x1c   :  { %128 = vmatprep.subr.mxu0 %v67_v14  ;;  %v102_v44 = vld [vmem:[#allocation2 + $0x1a0] sm:$0xff]  ;;  %v101_v45 = vld [vmem:[#allocation2 + $0x198] sm:$0xff]  ;;  %v100_v46 = vld [vmem:[#allocation2 + $0x190] sm:$0xff] }
  0x1d   :  { %129 = vmatpush1.msra.mxu0 %v66_v15  ;;  %v99_v47 = vld [vmem:[#allocation2 + $0x188] sm:$0xff]  ;;  %v98_v48 = vld [vmem:[#allocation2 + $0x180] sm:$0xff]  ;;  %v97_v49 = vld [vmem:[#allocation2 + $0x178] sm:$0xff] }
  0x1e   :  { %130 = vmatprep.subr.mxu0 %v65_v16  ;;  %v96_v50 = vld [vmem:[#allocation2 + $0x170] sm:$0xff]  ;;  %v95_v51 = vld [vmem:[#allocation2 + $0x168] sm:$0xff]  ;;  %v94_v52 = vld [vmem:[#allocation2 + $0x160] sm:$0xff] }
  0x1f   :  { %131 = vmatpush1.msra.mxu0 %v64_v17  ;;  %v93_v53 = vld [vmem:[#allocation2 + $0x158] sm:$0xff]  ;;  %v92_v54 = vld [vmem:[#allocation2 + $0x150] sm:$0xff]  ;;  %v91_v55 = vld [vmem:[#allocation2 + $0x148] sm:$0xff] }
  0x20   :  { %132 = vmatprep.subr.mxu0 %v63_v18  ;;  %v90_v56 = vld [vmem:[#allocation2 + $0x140] sm:$0xff]  ;;  %v89_v57 = vld [vmem:[#allocation2 + $0x138] sm:$0xff]  ;;  %v88_v58 = vld [vmem:[#allocation2 + $0x130] sm:$0xff] }
  0x21   :  { %133 = vmatpush1.msra.mxu0 %v62_v19  ;;  %v87_v59 = vld [vmem:[#allocation2 + $0x128] sm:$0xff]  ;;  %v86_v60 = vld [vmem:[#allocation2 + $0x120] sm:$0xff]  ;;  %v85_v61 = vld [vmem:[#allocation2 + $0x118] sm:$0xff] }
  0x22   :  { %134 = vmatprep.subr.mxu0 %v61_v20  ;;  %v84_v62 = vld [vmem:[#allocation2 + $0x110] sm:$0xff]  ;;  %v83_v63 = vld [vmem:[#allocation2 + $0x108] sm:$0xff]  ;;  %v82_v0 = vld [vmem:[#allocation2 + $0x100] sm:$0xff] }
  0x23   :  { %135 = vmatpush1.msra.mxu0 %v60_v21  ;;  %v48_v1 = vld [vmem:[%s260_s0] sm:$0xff] }
  0x24   :  { %136 = vmatprep.subr.mxu0 %v59_v22  ;;  %v32_v5 = vld [vmem:[%s262_s2] sm:$0x3] }
  0x25   :  { %137 = vmatpush1.msra.mxu0 %v58_v23  ;;  %v37_v7 = vrot.slane %v32_v5, %v36_v4  ;;  %v41_v8 = vrot.slane %v32_v5, %v40_v6 }
  0x26   :  { %138 = vmatprep.subr.mxu0 %v57_v25 }
  0x27   :  { %139 = vmatpush1.msra.mxu0 %v56_v26 }
  0x28   :  { %140 = vmatprep.subr.mxu0 %v55_v27 }
  0x29   :  { %141 = vmatpush1.msra.mxu0 %v54_v28 }
  0x2a   :  { %142 = vmatprep.subr.mxu0 %v53_v29 }
  0x2b   :  { %143 = vmatpush1.msra.mxu0 %v52_v30 }
  0x2c   :  { %144 = vmatprep.subr.mxu0 %v51_v31 }
  0x2d   :  { %145 = vmatpush1.msra.mxu0 %v50_v32 }
  0x2e   :  { %146 = vmatprep.subr.mxu0 %v113_v33 }
  0x2f   :  { %147 = vmatpush2.msra.mxu0 %v112_v34 }
  0x30   :  { %148 = vmatprep.subr.mxu0 %v111_v35 }
  0x31   :  { %149 = vmatpush2.msra.mxu0 %v110_v36 }
  0x32   :  { %150 = vmatprep.subr.mxu0 %v109_v37 }
  0x33   :  { %151 = vmatpush2.msra.mxu0 %v108_v38 }
  0x34   :  { %152 = vmatprep.subr.mxu0 %v107_v39 }
  0x35   :  { %153 = vmatpush2.msra.mxu0 %v106_v40 }
  0x36   :  { %154 = vmatprep.subr.mxu0 %v105_v41 }
  0x37   :  { %155 = vmatpush2.msra.mxu0 %v104_v42 }
  0x38   :  { %156 = vmatprep.subr.mxu0 %v103_v43 }
  0x39   :  { %157 = vmatpush2.msra.mxu0 %v102_v44 }
  0x3a   :  { %158 = vmatprep.subr.mxu0 %v101_v45 }
  0x3b   :  { %159 = vmatpush2.msra.mxu0 %v100_v46 }
  0x3c   :  { %160 = vmatprep.subr.mxu0 %v99_v47 }
  0x3d   :  { %161 = vmatpush2.msra.mxu0 %v98_v48 }
  0x3e   :  { %162 = vmatprep.subr.mxu0 %v97_v49 }
  0x3f   :  { %163 = vmatpush2.msra.mxu0 %v96_v50 }
  0x40   :  { %164 = vmatprep.subr.mxu0 %v95_v51 }
  0x41   :  { %165 = vmatpush2.msra.mxu0 %v94_v52 }
  0x42   :  { %166 = vmatprep.subr.mxu0 %v93_v53 }
  0x43   :  { %167 = vmatpush2.msra.mxu0 %v92_v54 }
  0x44   :  { %168 = vmatprep.subr.mxu0 %v91_v55 }
  0x45   :  { %169 = vmatpush2.msra.mxu0 %v90_v56 }
  0x46   :  { %170 = vmatprep.subr.mxu0 %v89_v57 }
  0x47   :  { %171 = vmatpush2.msra.mxu0 %v88_v58 }
  0x48   :  { %172 = vmatprep.subr.mxu0 %v87_v59 }
  0x49   :  { %173 = vmatpush2.msra.mxu0 %v86_v60 }
  0x4a   :  { %174 = vmatprep.subr.mxu0 %v85_v61 }
  0x4b   :  { %175 = vmatpush2.msra.mxu0 %v84_v62 }
  0x4c   :  { %176 = vmatprep.subr.mxu0 %v83_v63 }
  0x4d   :  { %177 = vmatpush2.msra.mxu0 %v82_v0 }
  0x4e   :  { %179 = vmatmul.mubr.f32.vlgmr.msra.gmra.mxu0 %v48_v1 }
 0x10e   :  { %v180_v9 = vpop.f32.mrf.mxu0 }
 0x10f   :  { %v185_v10 = vadd.f32 %v180_v9, %v37_v7 }
 0x110   :  { %v182_v11 = vpop.f32.mrf.mxu0 }
 0x111   :  { %187 = vst [vmem:[%s263_s3] sm:$0xff] %v185_v10  ;;  %v186_v12 = vadd.f32 %v182_v11, %v41_v8 }
 0x113   :  { %188 = vst [vmem:[%s263_s3 + $0x8] sm:$0xff] %v186_v12 }
 0x114   :  { %193 = vsyncpa [#allocation3], 1 }

</bundles_post_ra>
